<compile_context>
chip_gen: v7x
topology: tpu7x:2x2x1
jax: 0.10.0
libtpu: 0.0.40
codegen_flags: <defaults>
</compile_context>

<pallas_src>
import math
import functools

import jax
import jax.numpy as jnp
from jax.experimental import pallas as pl
from jax.experimental.pallas import tpu as pltpu

# ----------------------------- config ---------------------------------------
N_HEADS = 2
HIDDEN = 32
INTERMEDIATE = 64
SEQ = 8
BATCH = 2
LN_EPS = 1e-12
HEAD_DIM = HIDDEN // N_HEADS
LANE = 128


def _layer_norm(x, gamma, beta, eps):
    # torch.nn.LayerNorm over the last dim (biased variance)
    mean = jnp.mean(x, axis=-1, keepdims=True)
    var = jnp.mean((x - mean) ** 2, axis=-1, keepdims=True)
    return (x - mean) * jax.lax.rsqrt(var + eps) * gamma + beta


def _gelu(x):
    # x * 0.5 * (1 + erf(x / sqrt(2)))  (exact erf-based gelu, like the module)
    return x * 0.5 * (1.0 + jax.lax.erf(x / math.sqrt(2.0)))


# ------------------------------- kernel --------------------------------------
def transformer_layer_kernel(x_ref, mask_ref, w_ref, v_ref, out_ref,
                             *, B, S, H, I, n_heads):
    f32 = jnp.float32
    hd = H // n_heads

    # weight-slab row offsets (all multiples of 8 -> tile-aligned sublane slices)
    wo_off = 3 * n_heads * H
    w1_off = wo_off + H
    w2_off = w1_off + H
    vbase = 3 * n_heads            # first non-QKV row of the vector slab

    x = x_ref[...].astype(f32)                    # (B, S, H)
    x2d = x.reshape(B * S, H)
    mask = mask_ref[...].astype(f32)              # (B, S, S) additive attention mask

    vec = v_ref[...]                              # (16, 128): load once, slice value
    bo    = vec[vbase + 0:vbase + 1, :H]
    ln1_g = vec[vbase + 1:vbase + 2, :H]
    ln1_b = vec[vbase + 2:vbase + 3, :H]
    b1    = vec[vbase + 3:vbase + 4, :I]
    b2    = vec[vbase + 4:vbase + 5, :H]
    ln2_g = vec[vbase + 5:vbase + 6, :H]
    ln2_b = vec[vbase + 6:vbase + 7, :H]

    # ---------------- multi-head self-attention ----------------
    inv_sqrt_hd = 1.0 / math.sqrt(hd)

    def proj(g):
        # per-(component, head) projection; the weight block occupies its own
        # zero-padded 128-lane group, so no lane-offset slicing is ever needed
        # (zero lanes contribute 0 to every later contraction).
        wg = w_ref[pl.ds(g * H, H), :]                                   # (H, 128)
        y = jnp.dot(x2d, wg, preferred_element_type=f32) + vec[g:g + 1, :]
        return y.reshape(B, S, LANE)

    scores = []
    v_heads = []
    for h in range(n_heads):                      # tiny static unroll over heads
        qh = proj(0 * n_heads + h)                # (B, S, 128), real lanes [0, hd)
        kh = proj(1 * n_heads + h)
        v_heads.append(proj(2 * n_heads + h))
        scores.append(jnp.einsum("bqd,bkd->bqk", qh, kh,
                                 preferred_element_type=f32))            # (B, S, S)

    # fused softmax over all heads: one scale+mask add, one row-max, one exp,
    # one row-sum, one (approx EUP) reciprocal for the whole (nh*B, S, S) block.
    s = jnp.concatenate(scores, axis=0) * inv_sqrt_hd                    # (nh*B, S, S)
    s = s + jnp.concatenate([mask] * n_heads, axis=0)
    s = s - jnp.max(s, axis=-1, keepdims=True)
    p = jnp.exp(s)
    p = p * pl.reciprocal(jnp.sum(p, axis=-1, keepdims=True), approx=True)
    # attn_dropout: eval-mode identity

    # per-head context pushed straight through its row-slice of W_o (no concat)
    attn_acc = None
    for h in range(n_heads):
        ph = p[h * B:(h + 1) * B]                                        # (B, S, S)
        ctx = jnp.einsum("bqk,bkd->bqd", ph, v_heads[h],
                         preferred_element_type=f32)                     # (B, S, 128)
        ctx2d = ctx.reshape(B * S, LANE)[:, :hd]                         # offset-0 slice
        wo_h = w_ref[pl.ds(wo_off + h * hd, hd), :]                      # (hd, 128)
        part = jnp.dot(ctx2d, wo_h, preferred_element_type=f32)          # (B*S, 128)
        attn_acc = part if attn_acc is None else attn_acc + part

    attn2d = attn_acc[:, :H] + bo
    # out_dropout: eval-mode identity
    attn_out = _layer_norm(attn2d + x2d, ln1_g, ln1_b, LN_EPS)           # (B*S, H)

    # ---------------- point-wise feed-forward ----------------
    w1 = w_ref[pl.ds(w1_off, H), :]                                      # (H, 128)
    h1 = jnp.dot(attn_out, w1, preferred_element_type=f32)[:, :I] + b1
    h1 = _gelu(h1)
    w2 = w_ref[pl.ds(w2_off, I), :]                                      # (I, 128)
    h2 = jnp.dot(h1, w2, preferred_element_type=f32)[:, :H] + b2
    # hidden dropout: eval-mode identity
    ffn = _layer_norm(h2 + attn_out, ln2_g, ln2_b, LN_EPS)               # (B*S, H)

    out_ref[...] = ffn.reshape(B, S, H).astype(out_ref.dtype)


# ---------------------------- host-side packing -------------------------------
def _pad_lanes(a):
    return jnp.pad(a, ((0, 0), (0, LANE - a.shape[1])))


def _pack_params(params, n_heads):
    H = params["wq"].shape[0]
    hd = H // n_heads

    # Weight slab (rows, 128):
    #   rows [0, 3*nh*H)        : per-(component, head) Q/K/V blocks, lane-padded
    #   rows [3*nh*H, +H)       : W_o
    #   next H rows             : W_1
    #   next I rows             : W_2
    wrows = []
    for wc in (params["wq"], params["wk"], params["wv"]):
        for h in range(n_heads):
            wrows.append(_pad_lanes(wc[:, h * hd:(h + 1) * hd]))
    wrows.append(_pad_lanes(params["wo"]))
    wrows.append(_pad_lanes(params["w1"]))
    wrows.append(_pad_lanes(params["w2"]))
    w_slab = jnp.concatenate(wrows, axis=0)

    # Vector slab (16, 128): per-(component, head) QKV biases, then
    # [bo, ln1_g, ln1_b, b1, b2, ln2_g, ln2_b].
    vrows = []
    for bc in (params["bq"], params["bk"], params["bv"]):
        for h in range(n_heads):
            vrows.append(_pad_lanes(bc[:, h * hd:(h + 1) * hd]))
    for name in ("bo", "ln1_g", "ln1_b", "b1", "b2", "ln2_g", "ln2_b"):
        vrows.append(_pad_lanes(params[name]))
    v_slab = jnp.concatenate(vrows, axis=0)
    pad_rows = (-v_slab.shape[0]) % 8
    v_slab = jnp.pad(v_slab, ((0, pad_rows), (0, 0)))
    return w_slab, v_slab


def transformer_layer(x, mask, params):
    """x: (B, S, H) float32; mask: (B, S, S) additive attention mask."""
    B, S, H = x.shape
    I = params["w1"].shape[1]
    w_slab, v_slab = _pack_params(params, N_HEADS)

    kernel = functools.partial(
        transformer_layer_kernel, B=B, S=S, H=H, I=I, n_heads=N_HEADS)

    def vmem_spec():
        return pl.BlockSpec(memory_space=pltpu.MemorySpace.VMEM)

    return pl.pallas_call(
        kernel,
        out_shape=jax.ShapeDtypeStruct((B, S, H), x.dtype),
        in_specs=[vmem_spec() for _ in range(4)],
        out_specs=vmem_spec(),
    )(x, mask, w_slab, v_slab)


# ----------------------- pure-JAX reference (for checking) ------------------
def reference(x, mask, p):
    B, S, H = x.shape
    q = x @ p["wq"] + p["bq"][0]
    k = x @ p["wk"] + p["bk"][0]
    v = x @ p["wv"] + p["bv"][0]

    def split(t):  # (B, S, H) -> (B, nh, S, hd)
        return t.reshape(B, S, N_HEADS, HEAD_DIM).transpose(0, 2, 1, 3)

    qh, kh, vh = split(q), split(k), split(v)
    scores = jnp.einsum("bhqd,bhkd->bhqk", qh, kh) / math.sqrt(HEAD_DIM)
    scores = scores + mask[:, None, :, :]
    probs = jax.nn.softmax(scores, axis=-1)
    ctx = jnp.einsum("bhqk,bhkd->bhqd", probs, vh)
    ctx = ctx.transpose(0, 2, 1, 3).reshape(B, S, H)
    attn = ctx @ p["wo"] + p["bo"][0]
    attn_out = _layer_norm(attn + x, p["ln1_g"][0], p["ln1_b"][0], LN_EPS)
    h1 = _gelu(attn_out @ p["w1"] + p["b1"][0])
    h2 = h1 @ p["w2"] + p["b2"][0]
    return _layer_norm(h2 + attn_out, p["ln2_g"][0], p["ln2_b"][0], LN_EPS)


if __name__ == "__main__":
    key = jax.random.PRNGKey(0)
    keys = jax.random.split(key, 16)

    def lin(kw, fan_in, fan_out):
        bound = 1.0 / math.sqrt(fan_in)
        kw1, kw2 = jax.random.split(kw)
        w = jax.random.uniform(kw1, (fan_in, fan_out), jnp.float32, -bound, bound)
        b = jax.random.uniform(kw2, (1, fan_out), jnp.float32, -bound, bound)
        return w, b

    wq, bq = lin(keys[0], HIDDEN, HIDDEN)
    wk, bk = lin(keys[1], HIDDEN, HIDDEN)
    wv, bv = lin(keys[2], HIDDEN, HIDDEN)
    wo, bo = lin(keys[3], HIDDEN, HIDDEN)
    w1, b1 = lin(keys[4], HIDDEN, INTERMEDIATE)
    w2, b2 = lin(keys[5], INTERMEDIATE, HIDDEN)
    params = dict(
        wq=wq, bq=bq, wk=wk, bk=bk, wv=wv, bv=bv, wo=wo, bo=bo,
        ln1_g=jnp.ones((1, HIDDEN), jnp.float32),
        ln1_b=jnp.zeros((1, HIDDEN), jnp.float32),
        w1=w1, b1=b1, w2=w2, b2=b2,
        ln2_g=jnp.ones((1, HIDDEN), jnp.float32),
        ln2_b=jnp.zeros((1, HIDDEN), jnp.float32),
    )

    x = jax.random.normal(keys[6], (BATCH, SEQ, HIDDEN), jnp.float32)
    # additive attention mask: 0 for visible, -10000 for masked (causal-style)
    causal = jnp.tril(jnp.ones((SEQ, SEQ), jnp.float32))
    mask = jnp.broadcast_to((1.0 - causal) * -10000.0, (BATCH, SEQ, SEQ))

    out = transformer_layer(x, mask, params)
    jax.block_until_ready(out)

    ref = reference(x, mask, params)
    assert out.shape == (BATCH, SEQ, HIDDEN)
    # Tolerance absorbs the approx EUP reciprocal in the softmax denominator
    # (~1e-4-level after LayerNorm); structural bugs would be O(0.1 - 1).
    assert jnp.allclose(out, ref, atol=2e-3, rtol=2e-3), "mismatch vs reference"

    print("KERNEL_OK")
</pallas_src>

<mosaic_0001>
module attributes {stable_mosaic.version = 11 : i64} {
  func.func @transformer_layer_kernel(%arg0: memref<2x8x32xf32, #tpu.memory_space<vmem>>, %arg1: memref<2x8x8xf32, #tpu.memory_space<vmem>>, %arg2: memref<320x128xf32, #tpu.memory_space<vmem>>, %arg3: memref<16x128xf32, #tpu.memory_space<vmem>>, %arg4: memref<2x8x32xf32, #tpu.memory_space<vmem>>) attributes {dimension_semantics = [], scalar_prefetch = 0 : i64, scratch_operands = 0 : i64, tpu.core_type = #tpu.core_type<tc>} {
    %c0 = arith.constant 0 : index
    %c0_0 = arith.constant 0 : index
    %c0_1 = arith.constant 0 : index
    %0 = vector.load %arg0[%c0, %c0_0, %c0_1] : memref<2x8x32xf32, #tpu.memory_space<vmem>>, vector<2x8x32xf32>
    %1 = vector.shape_cast %0 : vector<2x8x32xf32> to vector<16x32xf32>
    %c0_2 = arith.constant 0 : index
    %c0_3 = arith.constant 0 : index
    %c0_4 = arith.constant 0 : index
    %2 = vector.load %arg1[%c0_2, %c0_3, %c0_4] : memref<2x8x8xf32, #tpu.memory_space<vmem>>, vector<2x8x8xf32>
    %c0_5 = arith.constant 0 : index
    %c0_6 = arith.constant 0 : index
    %3 = vector.load %arg3[%c0_5, %c0_6] : memref<16x128xf32, #tpu.memory_space<vmem>>, vector<16x128xf32>
    %4 = vector.extract_strided_slice %3 {offsets = [6, 0], sizes = [1, 32], strides = [1, 1]} : vector<16x128xf32> to vector<1x32xf32>
    %5 = vector.extract_strided_slice %3 {offsets = [7, 0], sizes = [1, 32], strides = [1, 1]} : vector<16x128xf32> to vector<1x32xf32>
    %6 = vector.extract_strided_slice %3 {offsets = [8, 0], sizes = [1, 32], strides = [1, 1]} : vector<16x128xf32> to vector<1x32xf32>
    %7 = vector.extract_strided_slice %3 {offsets = [9, 0], sizes = [1, 64], strides = [1, 1]} : vector<16x128xf32> to vector<1x64xf32>
    %8 = vector.extract_strided_slice %3 {offsets = [10, 0], sizes = [1, 32], strides = [1, 1]} : vector<16x128xf32> to vector<1x32xf32>
    %9 = vector.extract_strided_slice %3 {offsets = [11, 0], sizes = [1, 32], strides = [1, 1]} : vector<16x128xf32> to vector<1x32xf32>
    %10 = vector.extract_strided_slice %3 {offsets = [12, 0], sizes = [1, 32], strides = [1, 1]} : vector<16x128xf32> to vector<1x32xf32>
    %c0_7 = arith.constant 0 : index
    %c0_8 = arith.constant 0 : index
    %11 = vector.load %arg2[%c0_7, %c0_8] : memref<320x128xf32, #tpu.memory_space<vmem>>, vector<32x128xf32>
    %cst = arith.constant dense<0.000000e+00> : vector<16x128xf32>
    %12 = tpu.matmul %1, %11, %cst {dimension_numbers = #tpu.dot_dimension_numbers<[1], [0], [0], [1], [0, 0, 1, 1], [], []>} : vector<16x32xf32>, vector<32x128xf32>, vector<16x128xf32> -> vector<16x128xf32>
    %13 = vector.extract_strided_slice %3 {offsets = [0, 0], sizes = [1, 128], strides = [1, 1]} : vector<16x128xf32> to vector<1x128xf32>
    %14 = vector.broadcast %13 : vector<1x128xf32> to vector<16x128xf32>
    %15 = arith.addf %12, %14 : vector<16x128xf32>
    %16 = vector.shape_cast %15 : vector<16x128xf32> to vector<2x8x128xf32>
    %c64 = arith.constant 64 : index
    %c0_9 = arith.constant 0 : index
    %17 = vector.load %arg2[%c64, %c0_9] : memref<320x128xf32, #tpu.memory_space<vmem>>, vector<32x128xf32>
    %cst_10 = arith.constant dense<0.000000e+00> : vector<16x128xf32>
    %18 = tpu.matmul %1, %17, %cst_10 {dimension_numbers = #tpu.dot_dimension_numbers<[1], [0], [0], [1], [0, 0, 1, 1], [], []>} : vector<16x32xf32>, vector<32x128xf32>, vector<16x128xf32> -> vector<16x128xf32>
    %19 = vector.extract_strided_slice %3 {offsets = [2, 0], sizes = [1, 128], strides = [1, 1]} : vector<16x128xf32> to vector<1x128xf32>
    %20 = vector.broadcast %19 : vector<1x128xf32> to vector<16x128xf32>
    %21 = arith.addf %18, %20 : vector<16x128xf32>
    %22 = vector.shape_cast %21 : vector<16x128xf32> to vector<2x8x128xf32>
    %c128 = arith.constant 128 : index
    %c0_11 = arith.constant 0 : index
    %23 = vector.load %arg2[%c128, %c0_11] : memref<320x128xf32, #tpu.memory_space<vmem>>, vector<32x128xf32>
    %cst_12 = arith.constant dense<0.000000e+00> : vector<16x128xf32>
    %24 = tpu.matmul %1, %23, %cst_12 {dimension_numbers = #tpu.dot_dimension_numbers<[1], [0], [0], [1], [0, 0, 1, 1], [], []>} : vector<16x32xf32>, vector<32x128xf32>, vector<16x128xf32> -> vector<16x128xf32>
    %25 = vector.extract_strided_slice %3 {offsets = [4, 0], sizes = [1, 128], strides = [1, 1]} : vector<16x128xf32> to vector<1x128xf32>
    %26 = vector.broadcast %25 : vector<1x128xf32> to vector<16x128xf32>
    %27 = arith.addf %24, %26 : vector<16x128xf32>
    %28 = vector.shape_cast %27 : vector<16x128xf32> to vector<2x8x128xf32>
    "tpu.trace_start"() <{level = 10 : i32, message = "bqd,bkd->bqk"}> : () -> ()
    %cst_13 = arith.constant dense<0.000000e+00> : vector<2x8x8xf32>
    %29 = tpu.matmul %16, %22, %cst_13 {dimension_numbers = #tpu.dot_dimension_numbers<[2], [2], [1], [1], [0, 0, 0, 1, 1, 1], [0], [0]>} : vector<2x8x128xf32>, vector<2x8x128xf32>, vector<2x8x8xf32> -> vector<2x8x8xf32>
    "tpu.trace_stop"() : () -> ()
    %c32 = arith.constant 32 : index
    %c0_14 = arith.constant 0 : index
    %30 = vector.load %arg2[%c32, %c0_14] : memref<320x128xf32, #tpu.memory_space<vmem>>, vector<32x128xf32>
    %cst_15 = arith.constant dense<0.000000e+00> : vector<16x128xf32>
    %31 = tpu.matmul %1, %30, %cst_15 {dimension_numbers = #tpu.dot_dimension_numbers<[1], [0], [0], [1], [0, 0, 1, 1], [], []>} : vector<16x32xf32>, vector<32x128xf32>, vector<16x128xf32> -> vector<16x128xf32>
    %32 = vector.extract_strided_slice %3 {offsets = [1, 0], sizes = [1, 128], strides = [1, 1]} : vector<16x128xf32> to vector<1x128xf32>
    %33 = vector.broadcast %32 : vector<1x128xf32> to vector<16x128xf32>
    %34 = arith.addf %31, %33 : vector<16x128xf32>
    %35 = vector.shape_cast %34 : vector<16x128xf32> to vector<2x8x128xf32>
    %c96 = arith.constant 96 : index
    %c0_16 = arith.constant 0 : index
    %36 = vector.load %arg2[%c96, %c0_16] : memref<320x128xf32, #tpu.memory_space<vmem>>, vector<32x128xf32>
    %cst_17 = arith.constant dense<0.000000e+00> : vector<16x128xf32>
    %37 = tpu.matmul %1, %36, %cst_17 {dimension_numbers = #tpu.dot_dimension_numbers<[1], [0], [0], [1], [0, 0, 1, 1], [], []>} : vector<16x32xf32>, vector<32x128xf32>, vector<16x128xf32> -> vector<16x128xf32>
    %38 = vector.extract_strided_slice %3 {offsets = [3, 0], sizes = [1, 128], strides = [1, 1]} : vector<16x128xf32> to vector<1x128xf32>
    %39 = vector.broadcast %38 : vector<1x128xf32> to vector<16x128xf32>
    %40 = arith.addf %37, %39 : vector<16x128xf32>
    %41 = vector.shape_cast %40 : vector<16x128xf32> to vector<2x8x128xf32>
    %c160 = arith.constant 160 : index
    %c0_18 = arith.constant 0 : index
    %42 = vector.load %arg2[%c160, %c0_18] : memref<320x128xf32, #tpu.memory_space<vmem>>, vector<32x128xf32>
    %cst_19 = arith.constant dense<0.000000e+00> : vector<16x128xf32>
    %43 = tpu.matmul %1, %42, %cst_19 {dimension_numbers = #tpu.dot_dimension_numbers<[1], [0], [0], [1], [0, 0, 1, 1], [], []>} : vector<16x32xf32>, vector<32x128xf32>, vector<16x128xf32> -> vector<16x128xf32>
    %44 = vector.extract_strided_slice %3 {offsets = [5, 0], sizes = [1, 128], strides = [1, 1]} : vector<16x128xf32> to vector<1x128xf32>
    %45 = vector.broadcast %44 : vector<1x128xf32> to vector<16x128xf32>
    %46 = arith.addf %43, %45 : vector<16x128xf32>
    %47 = vector.shape_cast %46 : vector<16x128xf32> to vector<2x8x128xf32>
    "tpu.trace_start"() <{level = 10 : i32, message = "bqd,bkd->bqk"}> : () -> ()
    %cst_20 = arith.constant dense<0.000000e+00> : vector<2x8x8xf32>
    %48 = tpu.matmul %35, %41, %cst_20 {dimension_numbers = #tpu.dot_dimension_numbers<[2], [2], [1], [1], [0, 0, 0, 1, 1, 1], [0], [0]>} : vector<2x8x128xf32>, vector<2x8x128xf32>, vector<2x8x8xf32> -> vector<2x8x8xf32>
    "tpu.trace_stop"() : () -> ()
    %49 = tpu.concatenate %29, %48 in 0 : vector<2x8x8xf32>, vector<2x8x8xf32> -> vector<4x8x8xf32>
    %cst_21 = arith.constant 2.500000e-01 : f32
    %50 = vector.broadcast %cst_21 : f32 to vector<4x8x8xf32>
    %51 = arith.mulf %49, %50 : vector<4x8x8xf32>
    %52 = tpu.concatenate %2, %2 in 0 : vector<2x8x8xf32>, vector<2x8x8xf32> -> vector<4x8x8xf32>
    %53 = arith.addf %51, %52 : vector<4x8x8xf32>
    %cst_22 = arith.constant dense<0xFF800000> : vector<4x8xf32>
    %54 = vector.multi_reduction <maximumf>, %53, %cst_22 [2] : vector<4x8x8xf32> to vector<4x8xf32>
    %55 = vector.shape_cast %54 : vector<4x8xf32> to vector<4x8x1xf32>
    %56 = vector.broadcast %55 : vector<4x8x1xf32> to vector<4x8x8xf32>
    %57 = arith.subf %53, %56 : vector<4x8x8xf32>
    %58 = math.exp %57 : vector<4x8x8xf32>
    %cst_23 = arith.constant dense<0.000000e+00> : vector<4x8xf32>
    %59 = vector.multi_reduction <add>, %58, %cst_23 [2] : vector<4x8x8xf32> to vector<4x8xf32>
    %60 = vector.shape_cast %59 : vector<4x8xf32> to vector<4x8x1xf32>
    %61 = tpu.reciprocal %60 {approx = true} : vector<4x8x1xf32> -> vector<4x8x1xf32>
    %62 = vector.broadcast %61 : vector<4x8x1xf32> to vector<4x8x8xf32>
    %63 = arith.mulf %58, %62 : vector<4x8x8xf32>
    %64 = vector.extract_strided_slice %63 {offsets = [0, 0, 0], sizes = [2, 8, 8], strides = [1, 1, 1]} : vector<4x8x8xf32> to vector<2x8x8xf32>
    "tpu.trace_start"() <{level = 10 : i32, message = "bqk,bkd->bqd"}> : () -> ()
    %cst_24 = arith.constant dense<0.000000e+00> : vector<2x8x128xf32>
    %65 = tpu.matmul %64, %28, %cst_24 {dimension_numbers = #tpu.dot_dimension_numbers<[2], [1], [1], [2], [0, 0, 0, 1, 1, 2], [0], [0]>} : vector<2x8x8xf32>, vector<2x8x128xf32>, vector<2x8x128xf32> -> vector<2x8x128xf32>
    "tpu.trace_stop"() : () -> ()
    %66 = vector.shape_cast %65 : vector<2x8x128xf32> to vector<16x128xf32>
    %67 = vector.extract_strided_slice %66 {offsets = [0, 0], sizes = [16, 16], strides = [1, 1]} : vector<16x128xf32> to vector<16x16xf32>
    %c192 = arith.constant 192 : index
    %c0_25 = arith.constant 0 : index
    %68 = vector.load %arg2[%c192, %c0_25] : memref<320x128xf32, #tpu.memory_space<vmem>>, vector<16x128xf32>
    %cst_26 = arith.constant dense<0.000000e+00> : vector<16x128xf32>
    %69 = tpu.matmul %67, %68, %cst_26 {dimension_numbers = #tpu.dot_dimension_numbers<[1], [0], [0], [1], [0, 0, 1, 1], [], []>} : vector<16x16xf32>, vector<16x128xf32>, vector<16x128xf32> -> vector<16x128xf32>
    %70 = vector.extract_strided_slice %63 {offsets = [2, 0, 0], sizes = [2, 8, 8], strides = [1, 1, 1]} : vector<4x8x8xf32> to vector<2x8x8xf32>
    "tpu.trace_start"() <{level = 10 : i32, message = "bqk,bkd->bqd"}> : () -> ()
    %cst_27 = arith.constant dense<0.000000e+00> : vector<2x8x128xf32>
    %71 = tpu.matmul %70, %47, %cst_27 {dimension_numbers = #tpu.dot_dimension_numbers<[2], [1], [1], [2], [0, 0, 0, 1, 1, 2], [0], [0]>} : vector<2x8x8xf32>, vector<2x8x128xf32>, vector<2x8x128xf32> -> vector<2x8x128xf32>
    "tpu.trace_stop"() : () -> ()
    %72 = vector.shape_cast %71 : vector<2x8x128xf32> to vector<16x128xf32>
    %73 = vector.extract_strided_slice %72 {offsets = [0, 0], sizes = [16, 16], strides = [1, 1]} : vector<16x128xf32> to vector<16x16xf32>
    %c208 = arith.constant 208 : index
    %c0_28 = arith.constant 0 : index
    %74 = vector.load %arg2[%c208, %c0_28] : memref<320x128xf32, #tpu.memory_space<vmem>>, vector<16x128xf32>
    %cst_29 = arith.constant dense<0.000000e+00> : vector<16x128xf32>
    %75 = tpu.matmul %73, %74, %cst_29 {dimension_numbers = #tpu.dot_dimension_numbers<[1], [0], [0], [1], [0, 0, 1, 1], [], []>} : vector<16x16xf32>, vector<16x128xf32>, vector<16x128xf32> -> vector<16x128xf32>
    %76 = arith.addf %69, %75 : vector<16x128xf32>
    %77 = vector.extract_strided_slice %76 {offsets = [0, 0], sizes = [16, 32], strides = [1, 1]} : vector<16x128xf32> to vector<16x32xf32>
    %78 = vector.broadcast %4 : vector<1x32xf32> to vector<16x32xf32>
    %79 = arith.addf %77, %78 : vector<16x32xf32>
    %80 = arith.addf %79, %1 : vector<16x32xf32>
    %cst_30 = arith.constant dense<0.000000e+00> : vector<16xf32>
    %81 = vector.multi_reduction <add>, %80, %cst_30 [1] : vector<16x32xf32> to vector<16xf32>
    %82 = vector.shape_cast %81 : vector<16xf32> to vector<16x1xf32>
    %cst_31 = arith.constant 3.200000e+01 : f32
    %83 = vector.broadcast %cst_31 : f32 to vector<16x1xf32>
    %84 = arith.divf %82, %83 : vector<16x1xf32>
    %85 = vector.broadcast %84 : vector<16x1xf32> to vector<16x32xf32>
    %86 = arith.subf %80, %85 : vector<16x32xf32>
    %87 = arith.mulf %86, %86 : vector<16x32xf32>
    %cst_32 = arith.constant dense<0.000000e+00> : vector<16xf32>
    %88 = vector.multi_reduction <add>, %87, %cst_32 [1] : vector<16x32xf32> to vector<16xf32>
    %89 = vector.shape_cast %88 : vector<16xf32> to vector<16x1xf32>
    %cst_33 = arith.constant 3.200000e+01 : f32
    %90 = vector.broadcast %cst_33 : f32 to vector<16x1xf32>
    %91 = arith.divf %89, %90 : vector<16x1xf32>
    %92 = vector.broadcast %84 : vector<16x1xf32> to vector<16x32xf32>
    %93 = arith.subf %80, %92 : vector<16x32xf32>
    %cst_34 = arith.constant 9.99999996E-13 : f32
    %94 = vector.broadcast %cst_34 : f32 to vector<16x1xf32>
    %95 = arith.addf %91, %94 : vector<16x1xf32>
    %96 = math.rsqrt %95 : vector<16x1xf32>
    %97 = vector.broadcast %96 : vector<16x1xf32> to vector<16x32xf32>
    %98 = arith.mulf %93, %97 : vector<16x32xf32>
    %99 = vector.broadcast %5 : vector<1x32xf32> to vector<16x32xf32>
    %100 = arith.mulf %98, %99 : vector<16x32xf32>
    %101 = vector.broadcast %6 : vector<1x32xf32> to vector<16x32xf32>
    %102 = arith.addf %100, %101 : vector<16x32xf32>
    %c224 = arith.constant 224 : index
    %c0_35 = arith.constant 0 : index
    %103 = vector.load %arg2[%c224, %c0_35] : memref<320x128xf32, #tpu.memory_space<vmem>>, vector<32x128xf32>
    %cst_36 = arith.constant dense<0.000000e+00> : vector<16x128xf32>
    %104 = tpu.matmul %102, %103, %cst_36 {dimension_numbers = #tpu.dot_dimension_numbers<[1], [0], [0], [1], [0, 0, 1, 1], [], []>} : vector<16x32xf32>, vector<32x128xf32>, vector<16x128xf32> -> vector<16x128xf32>
    %105 = vector.extract_strided_slice %104 {offsets = [0, 0], sizes = [16, 64], strides = [1, 1]} : vector<16x128xf32> to vector<16x64xf32>
    %106 = vector.broadcast %7 : vector<1x64xf32> to vector<16x64xf32>
    %107 = arith.addf %105, %106 : vector<16x64xf32>
    %cst_37 = arith.constant 5.000000e-01 : f32
    %108 = vector.broadcast %cst_37 : f32 to vector<16x64xf32>
    %109 = arith.mulf %107, %108 : vector<16x64xf32>
    %cst_38 = arith.constant 1.41421354 : f32
    %110 = vector.broadcast %cst_38 : f32 to vector<16x64xf32>
    %111 = arith.divf %107, %110 : vector<16x64xf32>
    %112 = math.erf %111 : vector<16x64xf32>
    %cst_39 = arith.constant 1.000000e+00 : f32
    %113 = vector.broadcast %cst_39 : f32 to vector<16x64xf32>
    %114 = arith.addf %113, %112 : vector<16x64xf32>
    %115 = arith.mulf %109, %114 : vector<16x64xf32>
    %c256 = arith.constant 256 : index
    %c0_40 = arith.constant 0 : index
    %116 = vector.load %arg2[%c256, %c0_40] : memref<320x128xf32, #tpu.memory_space<vmem>>, vector<64x128xf32>
    %cst_41 = arith.constant dense<0.000000e+00> : vector<16x128xf32>
    %117 = tpu.matmul %115, %116, %cst_41 {dimension_numbers = #tpu.dot_dimension_numbers<[1], [0], [0], [1], [0, 0, 1, 1], [], []>} : vector<16x64xf32>, vector<64x128xf32>, vector<16x128xf32> -> vector<16x128xf32>
    %118 = vector.extract_strided_slice %117 {offsets = [0, 0], sizes = [16, 32], strides = [1, 1]} : vector<16x128xf32> to vector<16x32xf32>
    %119 = vector.broadcast %8 : vector<1x32xf32> to vector<16x32xf32>
    %120 = arith.addf %118, %119 : vector<16x32xf32>
    %121 = arith.addf %120, %102 : vector<16x32xf32>
    %cst_42 = arith.constant dense<0.000000e+00> : vector<16xf32>
    %122 = vector.multi_reduction <add>, %121, %cst_42 [1] : vector<16x32xf32> to vector<16xf32>
    %123 = vector.shape_cast %122 : vector<16xf32> to vector<16x1xf32>
    %cst_43 = arith.constant 3.200000e+01 : f32
    %124 = vector.broadcast %cst_43 : f32 to vector<16x1xf32>
    %125 = arith.divf %123, %124 : vector<16x1xf32>
    %126 = vector.broadcast %125 : vector<16x1xf32> to vector<16x32xf32>
    %127 = arith.subf %121, %126 : vector<16x32xf32>
    %128 = arith.mulf %127, %127 : vector<16x32xf32>
    %cst_44 = arith.constant dense<0.000000e+00> : vector<16xf32>
    %129 = vector.multi_reduction <add>, %128, %cst_44 [1] : vector<16x32xf32> to vector<16xf32>
    %130 = vector.shape_cast %129 : vector<16xf32> to vector<16x1xf32>
    %cst_45 = arith.constant 3.200000e+01 : f32
    %131 = vector.broadcast %cst_45 : f32 to vector<16x1xf32>
    %132 = arith.divf %130, %131 : vector<16x1xf32>
    %133 = vector.broadcast %125 : vector<16x1xf32> to vector<16x32xf32>
    %134 = arith.subf %121, %133 : vector<16x32xf32>
    %cst_46 = arith.constant 9.99999996E-13 : f32
    %135 = vector.broadcast %cst_46 : f32 to vector<16x1xf32>
    %136 = arith.addf %132, %135 : vector<16x1xf32>
    %137 = math.rsqrt %136 : vector<16x1xf32>
    %138 = vector.broadcast %137 : vector<16x1xf32> to vector<16x32xf32>
    %139 = arith.mulf %134, %138 : vector<16x32xf32>
    %140 = vector.broadcast %9 : vector<1x32xf32> to vector<16x32xf32>
    %141 = arith.mulf %139, %140 : vector<16x32xf32>
    %142 = vector.broadcast %10 : vector<1x32xf32> to vector<16x32xf32>
    %143 = arith.addf %141, %142 : vector<16x32xf32>
    %144 = vector.shape_cast %143 : vector<16x32xf32> to vector<2x8x32xf32>
    %c0_47 = arith.constant 0 : index
    %c0_48 = arith.constant 0 : index
    %c0_49 = arith.constant 0 : index
    %145 = vector.load %arg4[%c0_47, %c0_48, %c0_49] : memref<2x8x32xf32, #tpu.memory_space<vmem>>, vector<2x8x32xf32>
    tpu.vector_store %arg4[%c0_47, %c0_48, %c0_49], %144 {strides = array<i32>} : memref<2x8x32xf32, #tpu.memory_space<vmem>>, vector<2x8x32xf32>,
    return
  }
}

</mosaic_0001>

<bundles_post_ra>
// kernel: tpu_custom_call.1
= control target key start
LH: loop header
LB: loop body
LE: loop exit
PB: predicated region body
PF: predicated region fallthrough
CT: control target
= control target key end

     0   :  { %9 = vsyncpa [#allocation3], 0  ;;  %s2417_s0 = inlined_call_operand.hbm [shape: f32[2,8,32], index: 0, kind: input, shape index: {}]   ;;  %s2418_s1 = inlined_call_operand.hbm [shape: f32[2,8,8], index: 1, kind: input, shape index: {}]   ;;  %s2419_s2 = inlined_call_operand.hbm [shape: f32[320,128], index: 2, kind: input, shape index: {}]   ;;  %s2420_s3 = inlined_call_operand.hbm [shape: f32[16,128], index: 3, kind: input, shape index: {}]   ;;  %s2421_s4 = inlined_call_operand.hbm [shape: f32[2,8,32], index: 4, kind: output, shape index: {}]  }
   0x1   :  { %10 = vsyncpa [#allocation6], 0 }
   0x2   :  { %11 = vsyncpa [#allocation9], 0 }
   0x3   :  { %12 = vsyncpa [#allocation4], 0  ;;  %s2169_s15 = smov [#allocation5]   ;;  %s2170_s17 = smov [#allocation2]  }
   0x4   :  { %s30_s16 = sshll.u32 %s2169_s15, 4  ;;  %s18_s18 = sshll.u32 %s2170_s17, 4  ;;  %s31_s16 = int_to_ptr.vmem [resolvable:$true] %s30_s16  ;;  %s2203_s18 = int_to_ptr.vmem [resolvable:$true] %s18_s18 }
   0x5   :  { %s2051_s21 = scalar_lea.hbm %s2418_s1, 256 }
   0x6   :  { %p2052_p0 = scmp.ne.s32.totalorder %s2418_s1, %s2051_s21  ;;  %p2055_p1 = scmp.lt.u32.totalorder %s2051_s21, %s2418_s1 }
   0x8   :  { %p2057_p2 = pnand %p2055_p1, %p2052_p0 }
   0xa   :  { %2060 = shalt.err (!%p2057_p2)
}
   0xb   :  { %s2061_s26 = scalar_lea.vmem %s31_s16, 256  ;;  %p2066_p4 = scmp.lt.s32.totalorder %s31_s16, %s31_s16 }
   0xc   :  { %p2062_p3 = scmp.ne.s32.totalorder %s31_s16, %s2061_s26  ;;  %p2067_p5 = scmp.lt.s32.totalorder %s2061_s26, %s2061_s26 }
   0xe   :  { %p2068_p6 = por %p2067_p5, %p2066_p4 }
  0x10   :  { %p2069_p7 = pnand %p2068_p6, %p2062_p3 }
  0x12   :  { %2072 = shalt.err (!%p2069_p7)
}
  0x13   :  { %s2171_s27 = smov 128   ;;  %s2172_s28 = smov 8  }
  0x14   :  { %36 = dma.hbm_to_vmem [thread:$0]  %s2418_s1, 256, %s31_s16, [#allocation6], %s2171_s27, %s2171_s27, %s2172_s28  }
  0x15   :  { %s2073_s7 = scalar_lea.hbm %s2417_s0, 256 }
  0x16   :  { %p2074_p8 = scmp.ne.s32.totalorder %s2417_s0, %s2073_s7  ;;  %p2077_p9 = scmp.lt.u32.totalorder %s2073_s7, %s2417_s0 }
  0x18   :  { %p2079_p10 = pnand %p2077_p9, %p2074_p8 }
  0x1a   :  { %2082 = shalt.err (!%p2079_p10)
}
  0x1b   :  { %s2083_s12 = scalar_lea.vmem %s2203_s18, 256  ;;  %p2088_p12 = scmp.lt.s32.totalorder %s2203_s18, %s2203_s18 }
  0x1c   :  { %p2084_p11 = scmp.ne.s32.totalorder %s2203_s18, %s2083_s12  ;;  %p2089_p13 = scmp.lt.s32.totalorder %s2083_s12, %s2083_s12 }
  0x1e   :  { %p2090_p0 = por %p2089_p13, %p2088_p12 }
  0x20   :  { %p2091_p1 = pnand %p2090_p0, %p2084_p11 }
  0x22   :  { %2094 = shalt.err (!%p2091_p1)
}
  0x23   :  { %24 = dma.hbm_to_vmem [thread:$0]  %s2417_s0, 256, %s2203_s18, [#allocation3], %s2171_s27, %s2171_s27, %s2172_s28  }
  0x24   :  { %s2173_s14 = smov [#allocation7]   ;;  %s2174_s16 = smov [#allocation8]  }
  0x25   :  { %s42_s15 = sshll.u32 %s2173_s14, 4  ;;  %s54_s17 = sshll.u32 %s2174_s16, 4  ;;  %s43_s15 = int_to_ptr.vmem [resolvable:$true] %s42_s15  ;;  %s2240_s17 = int_to_ptr.vmem [resolvable:$true] %s54_s17 }
  0x26   :  { %s2095_s21 = scalar_lea.hbm %s2419_s2, 5120 }
  0x27   :  { %p2096_p2 = scmp.ne.s32.totalorder %s2419_s2, %s2095_s21  ;;  %p2099_p3 = scmp.lt.u32.totalorder %s2095_s21, %s2419_s2 }
  0x29   :  { %p2101_p4 = pnand %p2099_p3, %p2096_p2 }
  0x2b   :  { %2104 = shalt.err (!%p2101_p4)
}
  0x2c   :  { %s2105_s0 = scalar_lea.vmem %s43_s15, 5120  ;;  %p2110_p6 = scmp.lt.s32.totalorder %s43_s15, %s43_s15 }
  0x2d   :  { %p2106_p5 = scmp.ne.s32.totalorder %s43_s15, %s2105_s0  ;;  %p2111_p7 = scmp.lt.s32.totalorder %s2105_s0, %s2105_s0 }
  0x2f   :  { %p2112_p8 = por %p2111_p7, %p2110_p6 }
  0x31   :  { %p2113_p9 = pnand %p2112_p8, %p2106_p5 }
  0x33   :  { %2116 = shalt.err (!%p2113_p9)
}
  0x34   :  { %48 = dma.hbm_to_vmem [thread:$0]  %s2419_s2, 5120, %s43_s15, [#allocation6], %s2171_s27, %s2171_s27, %s2172_s28  }
  0x35   :  { %s2117_s5 = scalar_lea.hbm %s2420_s3, 256 }
  0x36   :  { %p2118_p10 = scmp.ne.s32.totalorder %s2420_s3, %s2117_s5  ;;  %p2121_p11 = scmp.lt.u32.totalorder %s2117_s5, %s2420_s3 }
  0x38   :  { %p2123_p12 = pnand %p2121_p11, %p2118_p10 }
  0x3a   :  { %2126 = shalt.err (!%p2123_p12)
}
  0x3b   :  { %s2127_s10 = scalar_lea.vmem %s2240_s17, 256  ;;  %p2132_p0 = scmp.lt.s32.totalorder %s2240_s17, %s2240_s17 }
  0x3c   :  { %p2128_p13 = scmp.ne.s32.totalorder %s2240_s17, %s2127_s10  ;;  %p2133_p1 = scmp.lt.s32.totalorder %s2127_s10, %s2127_s10 }
  0x3e   :  { %p2134_p2 = por %p2133_p1, %p2132_p0 }
  0x40   :  { %p2135_p3 = pnand %p2134_p2, %p2128_p13 }
  0x42   :  { %2138 = shalt.err (!%p2135_p3)
}
  0x43   :  { %60 = dma.hbm_to_vmem [thread:$0]  %s2420_s3, 256, %s2240_s17, [#allocation9], %s2171_s27, %s2171_s27, %s2172_s28  }
  0x44   :  { %2161 = dma.done.wait [#allocation3], 256  }
  0x45   :  { %2162 = vsyncadd [#allocation3], 4294967040 }
  0x46   :  { %2163 = dma.done.wait [#allocation6], 5376  }
  0x47   :  { %2164 = vsyncadd [#allocation6], 4294961920 }
  0x48   :  { %2165 = dma.done.wait [#allocation9], 256  }
  0x49   :  { %2166 = vsyncadd [#allocation9], 4294967040  ;;  %vm87_vm0 = vcmask 261120   ;;  %v79_v0 = vld [vmem:[#allocation7] sm:$0xff]  ;;  %v80_v1 = vld [vmem:[#allocation7 + $0x8] sm:$0xff]  ;;  %v2175_v16 = vmov 0.0   ;;  %v83_v27 = vlaneseq }
  0x4a   :  { %v81_v2 = vld [vmem:[#allocation7 + $0x10] sm:$0xff]  ;;  %v1932_v3 = vpack.c.bf16 %v80_v1, %v79_v0  ;;  %v82_v4 = vld [vmem:[#allocation7 + $0x18] sm:$0xff]  ;;  %v2277_v5 = vld [vmem:[#allocation2] sm:$0xff]  ;;  %vm2176_vm1 = vmmov 0   ;;  %vm872_vm2 = vcmask 64512   ;;  %vm1213_vm3 = vcmask 130048  }
  0x4b   :  { %v1936_v6 = vpack.c.bf16 %v82_v4, %v81_v2  ;;  %1790 = vmatprep.mubr.msk.f32.mxu1 %vm87_vm0, %v2277_v5  ;;  %v169_v7 = vld [vmem:[#allocation7 + $0x40] sm:$0xff]  ;;  %v170_v8 = vld [vmem:[#allocation7 + $0x48] sm:$0xff]  ;;  %1812 = vmatprep.mubr.msk.f32.mxu0 %vm87_vm0, %v2277_v5  ;;  %v171_v10 = vld [vmem:[#allocation7 + $0x50] sm:$0xff]  ;;  %v2302_v28 = vshrl.u32 %v83_v27, 7  ;;  %vm1533_vm4 = vcmask 523264   ;;  %s2177_s3 = smov [#allocation10]  }
  0x4c   :  { %1933 = vmatprep.subr.bf16.mxu1 %v1932_v3  ;;  %v1940_v9 = vpack.c.bf16 %v170_v8, %v169_v7  ;;  %v172_v11 = vld [vmem:[#allocation7 + $0x58] sm:$0xff]  ;;  %v2283_v12 = vld [vmem:[#allocation2 + $0x8] sm:$0xff]  ;;  %v252_v14 = vld [vmem:[#allocation7 + $0x80] sm:$0xff]  ;;  %s1668_s12 = sshll.u32 %s2177_s3, 4  ;;  %s1669_s12 = int_to_ptr.vmem [resolvable:$true] %s1668_s12 }
  0x4d   :  { %1935 = vmatpush3.bf16.msra.mxu1 %v1932_v3  ;;  %v1944_v13 = vpack.c.bf16 %v172_v11, %v171_v10  ;;  %v253_v15 = vld [vmem:[#allocation7 + $0x88] sm:$0xff]  ;;  %v254_v18 = vld [vmem:[#allocation7 + $0x90] sm:$0xff]  ;;  %v255_v19 = vld [vmem:[#allocation7 + $0x98] sm:$0xff]  ;;  %v175_v31 = vsub.s32 2, %v2302_v28  ;;  %v85_v33 = vsub.s32 0, %v2302_v28  ;;  %v258_v54 = vsub.s32 4, %v2302_v28  ;;  %p2144_p5 = scmp.lt.s32.totalorder %s1669_s12, %s1669_s12 }
  0x4e   :  { %1937 = vmatprep.subr.bf16.mxu1 %v1936_v6  ;;  %v1948_v17 = vpack.c.bf16 %v253_v15, %v252_v14  ;;  %v1952_v20 = vpack.c.bf16 %v255_v19, %v254_v18  ;;  %v475_v21 = vld [vmem:[#allocation7 + $0x20] sm:$0xff]  ;;  %v476_v22 = vld [vmem:[#allocation7 + $0x28] sm:$0xff]  ;;  %v477_v24 = vld [vmem:[#allocation7 + $0x30] sm:$0xff]  ;;  %v481_v11 = vsub.s32 1, %v2302_v28  ;;  %s2139_s1 = scalar_lea.vmem %s1669_s12, 256 }
  0x4f   :  { %v1956_v23 = vpack.c.bf16 %v476_v22, %v475_v21  ;;  %v478_v25 = vld [vmem:[#allocation7 + $0x38] sm:$0xff]  ;;  %v2305_v32 = vld [vmem:[#allocation8] sm:$0xff]  ;;  %v559_v40 = vld [vmem:[#allocation7 + $0x68] sm:$0xff]  ;;  %p2140_p4 = scmp.ne.s32.totalorder %s1669_s12, %s2139_s1  ;;  %p2145_p6 = scmp.lt.s32.totalorder %s2139_s1, %s2139_s1 }
  0x50   :  { %1949 = vmatprep.subr.bf16.mxu0 %v1948_v17  ;;  %v1960_v26 = vpack.c.bf16 %v478_v25, %v477_v24  ;;  %v176_v34 = vrot.slane %v2305_v32, %v175_v31  ;;  %v86_v36 = vrot.slane %v2305_v32, %v85_v33  ;;  %v558_v39 = vld [vmem:[#allocation7 + $0x60] sm:$0xff]  ;;  %v560_v44 = vld [vmem:[#allocation7 + $0x70] sm:$0xff]  ;;  %v561_v45 = vld [vmem:[#allocation7 + $0x78] sm:$0xff]  ;;  %v259_v56 = vrot.slane %v2305_v32, %v258_v54 }
  0x51   :  { %1939 = vmatpush3.bf16.msra.mxu1 %v1936_v6  ;;  %1951 = vmatpush3.bf16.msra.mxu0 %v1948_v17  ;;  %v1964_v42 = vpack.c.bf16 %v559_v40, %v558_v39  ;;  %v1968_v47 = vpack.c.bf16 %v561_v45, %v560_v44  ;;  %v641_v48 = vld [vmem:[#allocation7 + $0xa0] sm:$0xff]  ;;  %v642_v49 = vld [vmem:[#allocation7 + $0xa8] sm:$0xff]  ;;  %v643_v51 = vld [vmem:[#allocation7 + $0xb0] sm:$0xff]  ;;  %v482_v15 = vrot.slane %v2305_v32, %v481_v11  ;;  %p2146_p7 = por %p2145_p6, %p2144_p5 }
  0x52   :  { %1941 = vmatprep.subr.bf16.mxu1 %v1940_v9  ;;  %1953 = vmatprep.subr.bf16.mxu0 %v1952_v20  ;;  %v1972_v50 = vpack.c.bf16 %v642_v49, %v641_v48  ;;  %v644_v52 = vld [vmem:[#allocation7 + $0xb8] sm:$0xff]  ;;  %v75_v63 = vld [vmem:[#allocation5] sm:$0xff] }
  0x53   :  { %v1976_v53 = vpack.c.bf16 %v644_v52, %v643_v51  ;;  %v76_v4 = vld [vmem:[#allocation5 + $0x8] sm:$0xff]  ;;  %p2147_p8 = pnand %p2146_p7, %p2140_p4 }
  0x54   :  { %1791 = vmatmul.mubr.msk.f32.vlgmr.msra.gmra.mrb[0].mxu1 %vm87_vm0, %v2283_v12 }
  0x55   :  { %1943 = vmatpush3.bf16.msra.mxu1 %v1940_v9  ;;  %1801 = vmatprep.mubr.msk.f32.mxu1 %vm87_vm0, %v2277_v5  ;;  %v564_v9 = vsub.s32 3, %v2302_v28 }
  0x56   :  { %1945 = vmatprep.subr.bf16.mxu1 %v1944_v13  ;;  %1955 = vmatpush3.bf16.msra.mxu0 %v1952_v20 }
  0x57   :  { %1957 = vmatprep.subr.bf16.mxu0 %v1956_v23  ;;  %v565_v14 = vrot.slane %v2305_v32, %v564_v9 }
  0x59   :  { %1947 = vmatpush3.bf16.msra.mxu1 %v1944_v13  ;;  %1813 = vmatmul.mubr.msk.f32.vlgmr.msra.gmra.mrb[0].mxu0 %vm87_vm0, %v2283_v12 }
  0x5a   :  { %1815 = vmatprep.subr.mxu1 %v2175_v16  ;;  %1959 = vmatpush3.bf16.msra.mxu0 %v1956_v23 }
  0x5b   :  { %1833 = vmatprep.mubr.msk.f32.mxu0 %vm87_vm0, %v2277_v5  ;;  %1961 = vmatprep.subr.bf16.mxu0 %v1960_v26 }
  0x5c   :  { %1802 = vmatmul.mubr.msk.f32.vlgmr.msra.gmra.mrb[2].mxu1 %vm87_vm0, %v2283_v12 }
  0x5d   :  { %1817 = vmatprep.mubr.msk.f32.mxu1 %vm2176_vm1, %v2175_v16 }
  0x5e   :  { %1963 = vmatpush3.bf16.msra.mxu0 %v1960_v26 }
  0x5f   :  { %1973 = vmatprep.subr.bf16.mxu0 %v1972_v50 }
  0x61   :  { %1834 = vmatmul.mubr.msk.f32.vlgmr.msra.gmra.mrb[2].mxu0 %vm87_vm0, %v2283_v12 }
  0x62   :  { %1855 = vmatprep.mubr.msk.f32.mxu0 %vm87_vm0, %v2277_v5  ;;  %1975 = vmatpush3.bf16.msra.mxu0 %v1972_v50 }
  0x63   :  { %1977 = vmatprep.subr.bf16.mxu0 %v1976_v53 }
  0x66   :  { %1979 = vmatpush3.bf16.msra.mxu0 %v1976_v53 }
  0x67   :  { %1868 = vmatprep.subr.mxu0 %v2175_v16 }
  0x69   :  { %1856 = vmatmul.mubr.msk.f32.vlgmr.msra.gmra.mrb[4].mxu0 %vm87_vm0, %v2283_v12 }
  0x6a   :  { %1870 = vmatprep.mubr.msk.f32.mxu0 %vm2176_vm1, %v2175_v16 }
 0x127   :  { %v1792_v29 = vpop.f32.mrb[0].mxu1 }
 0x128   :  { %v160_v30 = vpop.f32.mrb[1].mxu1  ;;  %v166_v46 = vadd.f32 %v1792_v29, %v86_v36 }
 0x129   :  { %v161_v41 = vadd.f32 %v160_v30, %v86_v36 }
 0x12c   :  { %v1814_v55 = vpop.f32.mrb[0].mxu0 }
 0x12d   :  { %v326_v57 = vpop.f32.mrb[1].mxu0  ;;  %v332_v58 = vadd.f32 %v1814_v55, %v259_v56 }
 0x12e   :  { %v327_v59 = vadd.f32 %v326_v57, %v259_v56 }
 0x12f   :  { %v1803_v35 = vpop.f32.mrb[2].mxu1 }
 0x130   :  { %v243_v37 = vpop.f32.mrb[3].mxu1  ;;  %v249_v43 = vadd.f32 %v1803_v35, %v176_v34  ;;  %1869 = vmatpush3.msra.mxu0 %v327_v59 }
 0x131   :  { %v244_v38 = vadd.f32 %v243_v37, %v176_v34  ;;  %1878 = vmatprep.subr.mxu0 %v2175_v16 }
 0x133   :  { %1816 = vmatpush3.xpose.msra.mxu1 %v244_v38 }
 0x134   :  { %1820 = vmatprep.subr.mxu1 %v2175_v16  ;;  %v1835_v60 = vpop.f32.mrb[2].mxu0 }
 0x135   :  { %v549_v61 = vpop.f32.mrb[3].mxu0  ;;  %v555_v22 = vadd.f32 %v1835_v60, %v482_v15 }
 0x136   :  { %1818 = vmatmul.mubr.f32.vlgmr.msra.gmra.mrb[4].mxu1 %v161_v41  ;;  %v550_v20 = vadd.f32 %v549_v61, %v482_v15 }
 0x137   :  { %1821 = vmatpush3.xpose.msra.mxu1 %v249_v43  ;;  %1822 = vmatprep.mubr.msk.f32.mxu1 %vm2176_vm1, %v2175_v16 }
 0x138   :  { %1965 = vmatprep.subr.bf16.mxu1 %v1964_v42 }
 0x13a   :  { %1823 = vmatmul.mubr.f32.vlgmr.msra.gmra.mrb[6].mxu1 %v166_v46 }
 0x13b   :  { %1967 = vmatpush3.bf16.msra.mxu1 %v1964_v42  ;;  %1844 = vmatprep.mubr.msk.f32.mxu1 %vm87_vm0, %v2277_v5 }
 0x13c   :  { %1969 = vmatprep.subr.bf16.mxu1 %v1968_v47  ;;  %v1857_v48 = vpop.f32.mrb[4].mxu0 }
 0x13d   :  { %v715_v49 = vpop.f32.mrb[5].mxu0 }
 0x13f   :  { %1971 = vmatpush3.bf16.msra.mxu1 %v1968_v47  ;;  %v647_v47 = vsub.s32 5, %v2302_v28 }
 0x140   :  { %1858 = vmatprep.subr.mxu1 %v2175_v16 }
 0x141   :  { %v648_v50 = vrot.slane %v2305_v32, %v647_v47 }
 0x142   :  { %1845 = vmatmul.mubr.msk.f32.vlgmr.msra.gmra.mrb[8].mxu1 %vm87_vm0, %v2283_v12 }
 0x143   :  { %1860 = vmatprep.mubr.msk.f32.mxu1 %vm2176_vm1, %v2175_v16  ;;  %v721_v51 = vadd.f32 %v1857_v48, %v648_v50  ;;  %v716_v55 = vadd.f32 %v715_v49, %v648_v50 }
 0x209   :  { %v401_v62 = vpop.f32.mrb[4].mxu1 }
 0x20a   :  { %v864_v0 = vmul.f32 0.25, %v401_v62  ;;  %v1819_v1 = vpop.f32.mrb[5].mxu1 }
 0x20c   :  { %v868_v2 = vadd.f32 %v864_v0, %v75_v63 }
 0x20d   :  { %v471_v3 = vpop.f32.mrb[6].mxu1 }
 0x20e   :  { %v865_v6 = vmul.f32 0.25, %v471_v3  ;;  %v1824_v7 = vpop.f32.mrb[7].mxu1  ;;  %v873_v8 = vsel %vm872_vm2, %v868_v2, -inf }
 0x20f   :  { %874 = vmax.xlane.f32.xlu0 %v873_v8 }
 0x210   :  { %v869_v10 = vadd.f32 %v865_v6, %v76_v4 }
 0x212   :  { %v876_v13 = vsel %vm872_vm2, %v869_v10, -inf }
 0x213   :  { %877 = vmax.xlane.f32.xlu0 %v876_v13 }
 0x215   :  { %v1846_v17 = vpop.f32.mrb[8].mxu1 }
 0x216   :  { %v632_v18 = vpop.f32.mrb[9].mxu1  ;;  %v638_v21 = vadd.f32 %v1846_v17, %v565_v14 }
 0x217   :  { %v633_v19 = vadd.f32 %v632_v18, %v565_v14 }
 0x219   :  { %1859 = vmatpush3.xpose.msra.mxu1 %v633_v19 }
 0x21a   :  { %1863 = vmatprep.subr.mxu1 %v2175_v16 }
 0x21c   :  { %1861 = vmatmul.mubr.f32.vlgmr.msra.gmra.mrb[10].mxu1 %v550_v20 }
 0x21d   :  { %1864 = vmatpush3.xpose.msra.mxu1 %v638_v21  ;;  %1865 = vmatprep.mubr.msk.f32.mxu1 %vm2176_vm1, %v2175_v16  ;;  %v1211_v21 = vld [vmem:[#allocation7 + $0xd0] sm:$0xff] }
 0x21e   :  { %1873 = vmatprep.subr.mxu1 %v2175_v16 }
 0x220   :  { %1866 = vmatmul.mubr.f32.vlgmr.msra.gmra.mrb[12].mxu1 %v555_v22  ;;  %v1212_v22 = vld [vmem:[#allocation7 + $0xd8] sm:$0xff] }
 0x221   :  { %1874 = vmatpush3.msra.mxu1 %v332_v58  ;;  %1875 = vmatprep.mubr.msk.f32.mxu1 %vm2176_vm1, %v2175_v16 }
 0x222   :  { %1883 = vmatprep.subr.mxu1 %v2175_v16 }
 0x29c   :  { %v875_v23 = vpop.xlane.xlu0 %874 }
 0x29d   :  { %v885_v24 = vsub.f32 %v868_v2, %v875_v23  ;;  %v1980_v23 = vpack.c.bf16 %v1212_v22, %v1211_v21  ;;  %v1528_v21 = vld [vmem:[#allocation7 + $0x118] sm:$0xff] }
 0x29f   :  { %v889_v25 = vmul.f32 1.442695, %v885_v24  ;;  %v1064_v24 = vld [vmem:[#allocation7 + $0xc8] sm:$0xff] }
 0x2a0   :  { %v878_v29 = vpop.xlane.xlu0 %877 }
 0x2a1   :  { %2023 = vpow2.f32 %v889_v25  ;;  %v886_v30 = vsub.f32 %v869_v10, %v878_v29 }
 0x2a3   :  { %v891_v34 = vmul.f32 1.442695, %v886_v30 }
 0x2a5   :  { %2025 = vpow2.f32 %v891_v34  ;;  %v1378_v34 = vsub.s32 6, %v2302_v28 }
 0x2ab   :  { %v2024_v26 = vpop.eup %2023 }
 0x2ac   :  { %v897_v27 = vsel %vm872_vm2, %v2024_v26, 0.0 }
 0x2ad   :  { %898 = vadd.xlane.f32.xlu0 %v897_v27 }
 0x2af   :  { %v2026_v45 = vpop.eup %2025 }
 0x2b0   :  { %v900_v46 = vsel %vm872_vm2, %v2026_v45, 0.0 }
 0x2ef   :  { %v790_v35 = vpop.f32.mrb[10].mxu1 }
 0x2f0   :  { %v866_v36 = vmul.f32 0.25, %v790_v35  ;;  %v1862_v37 = vpop.f32.mrb[11].mxu1  ;;  %v1379_v35 = vrot.slane %v2305_v32, %v1378_v34 }
 0x2f2   :  { %v870_v38 = vadd.f32 %v866_v36, %v75_v63 }
 0x2f3   :  { %v860_v39 = vpop.f32.mrb[12].mxu1 }
 0x2f4   :  { %v867_v40 = vmul.f32 0.25, %v860_v39  ;;  %v1867_v41 = vpop.f32.mrb[13].mxu1  ;;  %v879_v42 = vsel %vm872_vm2, %v870_v38, -inf }
 0x2f5   :  { %880 = vmax.xlane.f32.xlu1 %v879_v42 }
 0x2f6   :  { %v871_v43 = vadd.f32 %v867_v40, %v76_v4 }
 0x2f8   :  { %v882_v44 = vsel %vm872_vm2, %v871_v43, -inf }
 0x2f9   :  { %883 = vmax.xlane.f32.xlu1 %v882_v44 }
 0x2fd   :  { %901 = vadd.xlane.f32.xlu1 %v900_v46 }
 0x33a   :  { %v899_v52 = vpop.xlane.xlu0 %898 }
 0x33b   :  { %2027 = vrcp.f32 %v899_v52 }
 0x345   :  { %v2028_v53 = vpop.eup %2027 }
 0x346   :  { %v913_v56 = vmul.f32 %v2028_v53, %v2024_v26  ;;  %v1424_v53 = vld [vmem:[#allocation7 + $0xe8] sm:$0xff] }
 0x348   :  { %1871 = vmatmul.mubr.msk.f32.vlgmr.msra.gmra.mrb[6].mxu0 %vm872_vm2, %v913_v56  ;;  %v1425_v56 = vld [vmem:[#allocation7 + $0xf0] sm:$0xff] }
 0x349   :  { %1879 = vmatpush3.msra.mxu0 %v716_v55  ;;  %1880 = vmatprep.mubr.msk.f32.mxu0 %vm2176_vm1, %v2175_v16 }
 0x34a   :  { %1981 = vmatprep.subr.bf16.mxu0 %v1980_v23 }
 0x382   :  { %v881_v57 = vpop.xlane.xlu1 %880 }
 0x383   :  { %v887_v58 = vsub.f32 %v870_v38, %v881_v57  ;;  %v1426_v57 = vld [vmem:[#allocation7 + $0xf8] sm:$0xff] }
 0x385   :  { %v893_v59 = vmul.f32 1.442695, %v887_v58  ;;  %v1992_v58 = vpack.c.bf16 %v1426_v57, %v1425_v56 }
 0x386   :  { %v884_v60 = vpop.xlane.xlu1 %883 }
 0x387   :  { %2029 = vpow2.f32 %v893_v59  ;;  %v888_v61 = vsub.f32 %v871_v43, %v884_v60 }
 0x389   :  { %v895_v62 = vmul.f32 1.442695, %v888_v61 }
 0x38a   :  { %v902_v63 = vpop.xlane.xlu1 %901 }
 0x38b   :  { %2031 = vpow2.f32 %v895_v62 }
 0x38c   :  { %2033 = vrcp.f32 %v902_v63 }
 0x391   :  { %v2030_v0 = vpop.eup %2029 }
 0x392   :  { %v903_v1 = vsel %vm872_vm2, %v2030_v0, 0.0 }
 0x393   :  { %904 = vadd.xlane.f32.xlu0 %v903_v1  ;;  %v1413_v1 = vsub.s32 7, %v2302_v28 }
 0x395   :  { %v2032_v2 = vpop.eup %2031 }
 0x396   :  { %v2034_v3 = vpop.eup %2033  ;;  %v906_v4 = vsel %vm872_vm2, %v2032_v2, 0.0 }
 0x397   :  { %v914_v6 = vmul.f32 %v2034_v3, %v2026_v45  ;;  %907 = vadd.xlane.f32.xlu1 %v906_v4  ;;  %v1414_v3 = vrot.slane %v2305_v32, %v1413_v1  ;;  %v1527_v32 = vld [vmem:[#allocation7 + $0x110] sm:$0xff] }
 0x398   :  { %v2000_v22 = vpack.c.bf16 %v1528_v21, %v1527_v32 }
 0x399   :  { %1876 = vmatmul.mubr.msk.f32.vlgmr.msra.gmra.mrb[14].mxu1 %vm872_vm2, %v914_v6 }
 0x39a   :  { %1884 = vmatpush3.msra.mxu1 %v721_v51  ;;  %1885 = vmatprep.mubr.msk.f32.mxu1 %vm2176_vm1, %v2175_v16  ;;  %v1063_v16 = vld [vmem:[#allocation7 + $0xc0] sm:$0xff] }
 0x39b   :  { %v1984_v25 = vpack.c.bf16 %v1064_v24, %v1063_v16  ;;  %v1531_v24 = vld [vmem:[#allocation7 + $0x130] sm:$0xff] }
 0x41b   :  { %v986_v7 = vpop.f32.mrb[6].mxu0 }
 0x41c   :  { %v1872_v8 = vpop.f32.mrb[7].mxu0 }
 0x420   :  { %v905_v10 = vpop.xlane.xlu0 %904 }
 0x421   :  { %2035 = vrcp.f32 %v905_v10 }
 0x424   :  { %v908_v13 = vpop.xlane.xlu1 %907 }
 0x425   :  { %2037 = vrcp.f32 %v908_v13 }
 0x42b   :  { %v2036_v14 = vpop.eup %2035 }
 0x42c   :  { %v915_v15 = vmul.f32 %v2036_v14, %v2030_v0 }
 0x42e   :  { %1881 = vmatmul.mubr.msk.f32.vlgmr.msra.gmra.mrb[8].mxu0 %vm872_vm2, %v915_v15 }
 0x42f   :  { %v2038_v17 = vpop.eup %2037  ;;  %1983 = vmatpush3.bf16.msra.mxu0 %v1980_v23  ;;  %v1530_v23 = vld [vmem:[#allocation7 + $0x128] sm:$0xff] }
 0x430   :  { %v916_v18 = vmul.f32 %v2038_v17, %v2032_v2  ;;  %1985 = vmatprep.subr.bf16.mxu0 %v1984_v25  ;;  %v2376_v2 = vld [vmem:[#allocation8 + $0x8] sm:$0xff] }
 0x431   :  { %v1420_v8 = vrot.slane %v2376_v2, %v85_v33  ;;  %v1529_v33 = vld [vmem:[#allocation7 + $0x120] sm:$0xff] }
 0x432   :  { %1886 = vmatmul.mubr.msk.f32.vlgmr.msra.gmra.mrb[16].mxu1 %vm872_vm2, %v916_v18  ;;  %v1525_v18 = vld [vmem:[#allocation7 + $0x100] sm:$0xff]  ;;  %v2004_v16 = vpack.c.bf16 %v1530_v23, %v1529_v33 }
 0x46c   :  { %v1059_v19 = vpop.f32.mrb[14].mxu1 }
 0x46d   :  { %v1877_v20 = vpop.f32.mrb[15].mxu1 }
 0x501   :  { %v1134_v26 = vpop.f32.mrb[8].mxu0 }
 0x502   :  { %v1882_v27 = vpop.f32.mrb[9].mxu0  ;;  %1892 = vmatprep.mubr.msk.f32.mxu0 %vm1213_vm3, %v1134_v26 }
 0x503   :  { %v1511_v27 = vrot.slane %v2376_v2, %v481_v11  ;;  %v1618_v11 = vrot.slane %v2376_v2, %v175_v31 }
 0x505   :  { %v1207_v29 = vpop.f32.mrb[16].mxu1 }
 0x506   :  { %v1887_v30 = vpop.f32.mrb[17].mxu1  ;;  %1893 = vmatmul.mubr.msk.f32.vlgmr.msra.gmra.mrb[10].mxu0 %vm1213_vm3, %v1207_v29 }
 0x507   :  { %1987 = vmatpush3.bf16.msra.mxu0 %v1984_v25  ;;  %1899 = vmatprep.mubr.msk.f32.mxu0 %vm1213_vm3, %v986_v7  ;;  %v1532_v25 = vld [vmem:[#allocation7 + $0x138] sm:$0xff] }
 0x508   :  { %v2008_v26 = vpack.c.bf16 %v1532_v25, %v1531_v24 }
 0x50e   :  { %1900 = vmatmul.mubr.msk.f32.vlgmr.msra.gmra.mrb[10].mxu0 %vm1213_vm3, %v1059_v19  ;;  %v1526_v19 = vld [vmem:[#allocation7 + $0x108] sm:$0xff] }
 0x50f   :  { %v1996_v20 = vpack.c.bf16 %v1526_v19, %v1525_v18 }
 0x511   :  { %1997 = vmatprep.subr.bf16.mxu0 %v1996_v20 }
 0x512   :  { %1999 = vmatpush3.bf16.msra.mxu0 %v1996_v20 }
 0x513   :  { %2001 = vmatprep.subr.bf16.mxu0 %v2000_v22 }
 0x516   :  { %2003 = vmatpush3.bf16.msra.mxu0 %v2000_v22 }
 0x517   :  { %2005 = vmatprep.subr.bf16.mxu0 %v2004_v16 }
 0x51a   :  { %2007 = vmatpush3.bf16.msra.mxu0 %v2004_v16 }
 0x51b   :  { %2009 = vmatprep.subr.bf16.mxu0 %v2008_v26 }
 0x51e   :  { %2011 = vmatpush3.bf16.msra.mxu0 %v2008_v26 }
 0x5e1   :  { %v1901_v36 = vpop.f32.mrb[10].mxu0 }
 0x5e2   :  { %v1381_v37 = vadd.f32 %v1901_v36, %v1379_v35  ;;  %v1367_v38 = vpop.f32.mrb[11].mxu0 }
 0x5e3   :  { %v1380_v39 = vadd.f32 %v1379_v35, %v1367_v38 }
 0x5e4   :  { %v1383_v40 = vadd.f32 %v1381_v37, %v2283_v12 }
 0x5e5   :  { %v1382_v41 = vadd.f32 %v1380_v39, %v2277_v5  ;;  %v1423_v5 = vld [vmem:[#allocation7 + $0xe0] sm:$0xff] }
 0x5e6   :  { %v1387_v42 = vsel %vm87_vm0, %v1383_v40, 0.0  ;;  %v1988_v55 = vpack.c.bf16 %v1424_v53, %v1423_v5 }
 0x5e7   :  { %1388 = vadd.xlane.f32.xlu1 %v1387_v42  ;;  %v1384_v43 = vsel %vm87_vm0, %v1382_v41, 0.0 }
 0x5e8   :  { %1385 = vadd.xlane.f32.xlu0 %v1384_v43  ;;  %1989 = vmatprep.subr.bf16.mxu1 %v1988_v55 }
 0x5e9   :  { %1991 = vmatpush3.bf16.msra.mxu1 %v1988_v55 }
 0x5ea   :  { %1993 = vmatprep.subr.bf16.mxu1 %v1992_v58 }
 0x5ed   :  { %1995 = vmatpush3.bf16.msra.mxu1 %v1992_v58 }
 0x674   :  { %v1389_v44 = vpop.xlane.xlu1 %1388 }
 0x675   :  { %v1392_v45 = vmul.f32 0.03125, %v1389_v44  ;;  %v1386_v46 = vpop.xlane.xlu0 %1385 }
 0x676   :  { %v1391_v47 = vmul.f32 0.03125, %v1386_v46 }
 0x677   :  { %v1394_v48 = vsub.f32 %v1383_v40, %v1392_v45 }
 0x678   :  { %v1393_v49 = vsub.f32 %v1382_v41, %v1391_v47 }
 0x679   :  { %v1396_v50 = vmul.f32 %v1394_v48, %v1394_v48 }
 0x67a   :  { %v1395_v51 = vmul.f32 %v1393_v49, %v1393_v49 }
 0x67b   :  { %v1400_v52 = vsel %vm87_vm0, %v1396_v50, 0.0 }
 0x67c   :  { %1401 = vadd.xlane.f32.xlu1 %v1400_v52  ;;  %v1397_v12 = vsel %vm87_vm0, %v1395_v51, 0.0 }
 0x67d   :  { %1398 = vadd.xlane.f32.xlu0 %v1397_v12 }
 0x709   :  { %v1402_v59 = vpop.xlane.xlu1 %1401 }
 0x70a   :  { %v1404_v60 = vmul.f32 0.03125, %v1402_v59  ;;  %v1399_v61 = vpop.xlane.xlu0 %1398 }
 0x70b   :  { %v1403_v62 = vmul.f32 0.03125, %v1399_v61 }
 0x70c   :  { %v1406_v63 = vadd.f32 1e-12, %v1404_v60 }
 0x70d   :  { %v1405_v0 = vadd.f32 1e-12, %v1403_v62 }
 0x70e   :  { %2039 = vrsqrt.f32 %v1406_v63 }
 0x70f   :  { %2041 = vrsqrt.f32 %v1405_v0 }
 0x718   :  { %v2040_v4 = vpop.eup %2039 }
 0x719   :  { %v2042_v6 = vpop.eup %2041  ;;  %v1410_v7 = vmul.f32 %v2040_v4, %v1394_v48 }
 0x71a   :  { %v1409_v10 = vmul.f32 %v2042_v6, %v1393_v49  ;;  %v1652_v6 = vrot.slane %v2376_v2, %v564_v9 }
 0x71b   :  { %v1416_v13 = vmul.f32 %v1414_v3, %v1410_v7 }
 0x71c   :  { %v1415_v14 = vmul.f32 %v1414_v3, %v1409_v10  ;;  %v1658_v10 = vrot.slane %v2376_v2, %v258_v54 }
 0x71d   :  { %v1422_v17 = vadd.f32 %v1420_v8, %v1416_v13 }
 0x71e   :  { %v1421_v15 = vadd.f32 %v1420_v8, %v1415_v14 }
 0x720   :  { %1910 = vmatprep.mubr.msk.f32.mxu1 %vm87_vm0, %v1421_v15 }
 0x721   :  { %1911 = vmatmul.mubr.msk.f32.vlgmr.msra.gmra.mrb[18].mxu1 %vm87_vm0, %v1422_v17 }
 0x7f4   :  { %v1912_v29 = vpop.f32.mrb[18].mxu1 }
 0x7f5   :  { %v1513_v30 = vadd.f32 %v1912_v29, %v1511_v27  ;;  %v1499_v34 = vpop.f32.mrb[19].mxu1 }
 0x7f6   :  { %v1512_v35 = vadd.f32 %v1511_v27, %v1499_v34 }
 0x7f7   :  { %v1518_v36 = vmul.f32 0.70710677, %v1513_v30  ;;  %v1515_v43 = vmul.f32 0.5, %v1513_v30 }
 0x7f8   :  { %v1517_v37 = vmul.f32 0.70710677, %v1512_v35  ;;  %v1514_v41 = vmul.f32 0.5, %v1512_v35 }
 0x7f9   :  { %2043 = verf.f32 %v1518_v36 }
 0x7fa   :  { %2045 = verf.f32 %v1517_v37 }
 0x803   :  { %v2044_v38 = vpop.eup %2043 }
 0x804   :  { %v2046_v39 = vpop.eup %2045  ;;  %v1522_v40 = vadd.f32 1.0, %v2044_v38 }
 0x805   :  { %v1521_v42 = vadd.f32 1.0, %v2046_v39 }
 0x806   :  { %v1524_v45 = vmul.f32 %v1522_v40, %v1515_v43 }
 0x807   :  { %v1523_v44 = vmul.f32 %v1521_v42, %v1514_v41 }
 0x809   :  { %1929 = vmatprep.mubr.msk.f32.mxu0 %vm1533_vm4, %v1523_v44 }
 0x80a   :  { %1930 = vmatmul.mubr.msk.f32.vlgmr.msra.gmra.mrb[12].mxu0 %vm1533_vm4, %v1524_v45 }
 0x8dd   :  { %v1931_v46 = vpop.f32.mrb[12].mxu0 }
 0x8de   :  { %v1620_v47 = vadd.f32 %v1931_v46, %v1618_v11  ;;  %v1606_v48 = vpop.f32.mrb[13].mxu0 }
 0x8df   :  { %v1619_v49 = vadd.f32 %v1618_v11, %v1606_v48 }
 0x8e0   :  { %v1622_v50 = vadd.f32 %v1620_v47, %v1422_v17 }
 0x8e1   :  { %v1621_v51 = vadd.f32 %v1619_v49, %v1421_v15 }
 0x8e2   :  { %v1626_v52 = vsel %vm87_vm0, %v1622_v50, 0.0 }
 0x8e3   :  { %1627 = vadd.xlane.f32.xlu1 %v1626_v52  ;;  %v1623_v12 = vsel %vm87_vm0, %v1621_v51, 0.0 }
 0x8e4   :  { %1624 = vadd.xlane.f32.xlu0 %v1623_v12 }
 0x970   :  { %v1628_v5 = vpop.xlane.xlu1 %1627 }
 0x971   :  { %v1630_v53 = vmul.f32 0.03125, %v1628_v5  ;;  %v1625_v55 = vpop.xlane.xlu0 %1624 }
 0x972   :  { %v1629_v56 = vmul.f32 0.03125, %v1625_v55 }
 0x973   :  { %v1632_v57 = vsub.f32 %v1622_v50, %v1630_v53 }
 0x974   :  { %v1631_v58 = vsub.f32 %v1621_v51, %v1629_v56 }
 0x975   :  { %v1634_v59 = vmul.f32 %v1632_v57, %v1632_v57 }
 0x976   :  { %v1633_v31 = vmul.f32 %v1631_v58, %v1631_v58 }
 0x977   :  { %v1638_v60 = vsel %vm87_vm0, %v1634_v59, 0.0 }
 0x978   :  { %1639 = vadd.xlane.f32.xlu1 %v1638_v60  ;;  %v1635_v61 = vsel %vm87_vm0, %v1633_v31, 0.0 }
 0x979   :  { %1636 = vadd.xlane.f32.xlu0 %v1635_v61 }
 0xa05   :  { %v1640_v62 = vpop.xlane.xlu1 %1639 }
 0xa06   :  { %v1642_v63 = vmul.f32 0.03125, %v1640_v62  ;;  %v1637_v0 = vpop.xlane.xlu0 %1636 }
 0xa07   :  { %v1641_v1 = vmul.f32 0.03125, %v1637_v0 }
 0xa08   :  { %v1644_v3 = vadd.f32 1e-12, %v1642_v63 }
 0xa09   :  { %v1643_v4 = vadd.f32 1e-12, %v1641_v1 }
 0xa0a   :  { %2047 = vrsqrt.f32 %v1644_v3 }
 0xa0b   :  { %2049 = vrsqrt.f32 %v1643_v4 }
 0xa14   :  { %v2048_v7 = vpop.eup %2047 }
 0xa15   :  { %v2050_v8 = vpop.eup %2049  ;;  %v1648_v13 = vmul.f32 %v2048_v7, %v1632_v57 }
 0xa16   :  { %v1647_v14 = vmul.f32 %v2050_v8, %v1631_v58 }
 0xa17   :  { %v1654_v15 = vmul.f32 %v1652_v6, %v1648_v13 }
 0xa18   :  { %v1653_v17 = vmul.f32 %v1652_v6, %v1647_v14 }
 0xa19   :  { %v1660_v18 = vadd.f32 %v1658_v10, %v1654_v15 }
 0xa1a   :  { %v1659_v19 = vadd.f32 %v1658_v10, %v1653_v17 }
 0xa1b   :  { %1662 = vst.msk [vmem:[#allocation10 + $0x8] sm:$0xff] %vm87_vm0, %v1660_v18 }
 0xa1c   :  { %1661 = vst.msk [vmem:[#allocation10] sm:$0xff] %vm87_vm0, %v1659_v19 }
 0xa1d   :  { %2150 = shalt.err (!%p2147_p8)
}
 0xa1e   :  { %s2151_s15 = scalar_lea.hbm %s2421_s4, 256 }
 0xa1f   :  { %p2152_p9 = scmp.ne.s32.totalorder %s2421_s4, %s2151_s15  ;;  %p2155_p10 = scmp.lt.u32.totalorder %s2151_s15, %s2421_s4 }
 0xa21   :  { %p2157_p11 = pnand %p2155_p10, %p2152_p9 }
 0xa23   :  { %2160 = shalt.err (!%p2157_p11)
}
 0xa24   :  { %1674 = dma.vmem_to_hbm [thread:$0]  %s1669_s12, 256, %s2421_s4, [#allocation4], %s2171_s27, %s2171_s27, %s2172_s28  }
 0xa25   :  { %2167 = dma.done.wait [#allocation4], 256  }
 0xa26   :  { %2168 = vsyncadd [#allocation4], 4294967040 }
 0xa27   :  { %1678 = vsyncpa [#allocation3], 1 }
 0xa28   :  { %1679 = vsyncpa [#allocation6], 1 }
 0xa29   :  { %1680 = vsyncpa [#allocation9], 1 }
 0xa2a   :  { %1681 = vsyncpa [#allocation4], 1 }

</bundles_post_ra>
